<compile_context>
chip_gen: v6e
topology: v6e:2x2x1
jax: 0.10.0
libtpu: 0.0.40
codegen_flags: <defaults>
</compile_context>

<pallas_src>
import functools

import jax
import jax.numpy as jnp
from jax.experimental import pallas as pl
from jax.experimental.pallas import tpu as pltpu


def _silu_f32(v):
    # sigmoid lowers to the EUP transcendental path; kept in f32 (v5e-safe).
    return v * jax.nn.sigmoid(v)


def _dot_bf16(a_f32, w_bf16_ref):
    # bf16 MXU operands, f32 accumulate.
    return jnp.dot(
        a_f32.astype(jnp.bfloat16), w_bf16_ref[...],
        preferred_element_type=jnp.float32)


def vae_kernel(
    x_ref, eps_ref,
    w1_ref, b1_ref,
    w2_ref, b2_ref,
    wml_ref, bml_ref,       # fused mu|logvar head: (h2, 2L), (1, 2L)
    wo1_ref, bo1_ref,
    wo2_ref, bo2_ref,
    wo3_ref, bo3_ref,
    out_ref,                # (TB, D + 2L) slab = [x_hat | mu | logvar]
    *, latent_dim,
):
    L = latent_dim
    x = x_ref[...].astype(jnp.float32)
    eps = eps_ref[...].astype(jnp.float32)

    # ---- encoder ----
    h1 = _silu_f32(_dot_bf16(x, w1_ref) + b1_ref[...])
    h2 = _silu_f32(_dot_bf16(h1, w2_ref) + b2_ref[...])

    # fused mu|logvar head: one MXU pass, then static slice.
    ml = _dot_bf16(h2, wml_ref) + bml_ref[...]
    mu = ml[:, :L]
    logvar = ml[:, L:]

    # ---- reparametrize: z = mu + eps * exp(0.5 * logvar) (f32) ----
    z = mu + eps * jnp.exp(0.5 * logvar)

    # ---- decoder ----
    d1 = _silu_f32(_dot_bf16(z, wo1_ref) + bo1_ref[...])
    d2 = _silu_f32(_dot_bf16(d1, wo2_ref) + bo2_ref[...])
    x_hat = _dot_bf16(d2, wo3_ref) + bo3_ref[...]

    # single lane-dense store: [x_hat | mu | logvar]
    out_ref[...] = jnp.concatenate([x_hat, mu, logvar], axis=-1).astype(out_ref.dtype)


def _round_up(n, m):
    return (n + m - 1) // m * m


@jax.jit
def vae_forward(x, eps, params):
    """params: dict name -> (weight[in,out], bias[1,out]). Returns (x_hat, mu, logvar)."""
    B, D = x.shape
    L = eps.shape[1]

    # Batch tile: MXU-friendly 128 rows per grid step once batch is big enough,
    # otherwise a single grid step over the (8-row padded) whole batch.
    TB = 128 if B >= 128 else _round_up(max(B, 1), 8)
    B_pad = _round_up(B, TB)
    if B_pad != B:
        x = jnp.pad(x, ((0, B_pad - B), (0, 0)))
        eps = jnp.pad(eps, ((0, B_pad - B), (0, 0)))

    # Fuse mu/logvar heads into a single (h2, 2L) matmul.
    wmu, bmu = params["mu"]
    wlv, blv = params["logvar"]
    wml = jnp.concatenate([wmu, wlv], axis=1)
    bml = jnp.concatenate([bmu, blv], axis=1)

    layers = [
        params["fc1"], params["fc2"], (wml, bml),
        params["fc_out1"], params["fc_out2"], params["fc_out3"],
    ]

    flat_args = [x, eps]
    in_specs = [
        pl.BlockSpec((TB, D), lambda i: (i, 0)),   # x: batch-tiled
        pl.BlockSpec((TB, L), lambda i: (i, 0)),   # eps: batch-tiled
    ]
    for w, b in layers:
        w = w.astype(jnp.bfloat16)   # bf16 MXU operands
        b = b.astype(jnp.float32)    # f32 bias add on the VPU
        flat_args.extend([w, b])
        # Weights / biases stay VMEM-resident across all batch tiles.
        in_specs.append(pl.BlockSpec(w.shape, lambda i: (0, 0)))
        in_specs.append(pl.BlockSpec(b.shape, lambda i: (0, 0)))

    out_w = D + 2 * L
    slab = pl.pallas_call(
        functools.partial(vae_kernel, latent_dim=L),
        grid=(B_pad // TB,),
        out_shape=jax.ShapeDtypeStruct((B_pad, out_w), jnp.float32),
        in_specs=in_specs,
        out_specs=pl.BlockSpec((TB, out_w), lambda i: (i, 0)),
        compiler_params=pltpu.CompilerParams(
            dimension_semantics=("parallel",)),
    )(*flat_args)

    x_hat = slab[:B, :D]
    mu = slab[:B, D:D + L]
    logvar = slab[:B, D + L:]
    return x_hat, mu, logvar


def init_params(key, input_dim, latent_dim):
    """Deterministic kaiming-normal weights (fan_in mode) + small uniform biases,
    matching the PyTorch module's layer shapes. Weights stored as (in, out)."""
    h1 = input_dim * 2 // 3
    h2 = input_dim // 3

    layer_dims = {
        "fc1": (input_dim, h1),
        "fc2": (h1, h2),
        "mu": (h2, latent_dim),
        "logvar": (h2, latent_dim),
        "fc_out1": (latent_dim, h2),
        "fc_out2": (h2, h1),
        "fc_out3": (h1, input_dim),
    }

    params = {}
    for i, (name, (fan_in, fan_out)) in enumerate(layer_dims.items()):
        kw, kb = jax.random.split(jax.random.fold_in(key, i))
        std = jnp.sqrt(2.0 / fan_in)  # kaiming_normal_ (fan_in, relu gain)
        w = jax.random.normal(kw, (fan_in, fan_out), jnp.float32) * std
        bound = 1.0 / jnp.sqrt(fan_in)
        b = jax.random.uniform(kb, (1, fan_out), jnp.float32, -bound, bound)
        params[name] = (w, b)
    return params


if __name__ == "__main__":
    key = jax.random.PRNGKey(0)
    k_x, k_eps, k_p = jax.random.split(key, 3)

    batch = 8
    input_dim = 48
    latent_dim = 16

    x = jax.random.normal(k_x, (batch, input_dim), jnp.float32)
    # eps ~ N(0,1) for the reparametrization trick (torch.randn_like equivalent),
    # drawn outside the kernel for determinism.
    eps = jax.random.normal(k_eps, (batch, latent_dim), jnp.float32)

    params = init_params(k_p, input_dim, latent_dim)

    x_hat, mu, logvar = vae_forward(x, eps, params)
    jax.block_until_ready((x_hat, mu, logvar))

    assert x_hat.shape == (batch, input_dim)
    assert mu.shape == (batch, latent_dim)
    assert logvar.shape == (batch, latent_dim)
    assert bool(jnp.isfinite(x_hat).all())
    assert bool(jnp.isfinite(mu).all())
    assert bool(jnp.isfinite(logvar).all())

    print("KERNEL_OK")
</pallas_src>

<mosaic_0001>
module attributes {stable_mosaic.version = 11 : i64} {
  func.func @vae_kernel(%arg0: i32, %arg1: memref<8x48xf32, #tpu.memory_space<vmem>>, %arg2: memref<8x16xf32, #tpu.memory_space<vmem>>, %arg3: memref<48x32xbf16, #tpu.memory_space<vmem>>, %arg4: memref<1x32xf32, #tpu.memory_space<vmem>>, %arg5: memref<32x16xbf16, #tpu.memory_space<vmem>>, %arg6: memref<1x16xf32, #tpu.memory_space<vmem>>, %arg7: memref<16x32xbf16, #tpu.memory_space<vmem>>, %arg8: memref<1x32xf32, #tpu.memory_space<vmem>>, %arg9: memref<16x16xbf16, #tpu.memory_space<vmem>>, %arg10: memref<1x16xf32, #tpu.memory_space<vmem>>, %arg11: memref<16x32xbf16, #tpu.memory_space<vmem>>, %arg12: memref<1x32xf32, #tpu.memory_space<vmem>>, %arg13: memref<32x48xbf16, #tpu.memory_space<vmem>>, %arg14: memref<1x48xf32, #tpu.memory_space<vmem>>, %arg15: memref<8x80xf32, #tpu.memory_space<vmem>>) attributes {dimension_semantics = [#tpu.dimension_semantics<parallel>], iteration_bounds = array<i64: 1>, scalar_prefetch = 0 : i64, scratch_operands = 0 : i64, tpu.core_type = #tpu.core_type<tc>, window_params = [{transform_indices = @transform_0, window_bounds = array<i64: 8, 48>}, {transform_indices = @transform_1, window_bounds = array<i64: 8, 16>}, {pipeline_mode = #tpu.pipeline_mode<synchronous>, transform_indices = @transform_2, window_bounds = array<i64: 48, 32>}, {pipeline_mode = #tpu.pipeline_mode<synchronous>, transform_indices = @transform_3, window_bounds = array<i64: 1, 32>}, {pipeline_mode = #tpu.pipeline_mode<synchronous>, transform_indices = @transform_4, window_bounds = array<i64: 32, 16>}, {pipeline_mode = #tpu.pipeline_mode<synchronous>, transform_indices = @transform_5, window_bounds = array<i64: 1, 16>}, {pipeline_mode = #tpu.pipeline_mode<synchronous>, transform_indices = @transform_6, window_bounds = array<i64: 16, 32>}, {pipeline_mode = #tpu.pipeline_mode<synchronous>, transform_indices = @transform_7, window_bounds = array<i64: 1, 32>}, {pipeline_mode = #tpu.pipeline_mode<synchronous>, transform_indices = @transform_8, window_bounds = array<i64: 16, 16>}, {pipeline_mode = #tpu.pipeline_mode<synchronous>, transform_indices = @transform_9, window_bounds = array<i64: 1, 16>}, {pipeline_mode = #tpu.pipeline_mode<synchronous>, transform_indices = @transform_10, window_bounds = array<i64: 16, 32>}, {pipeline_mode = #tpu.pipeline_mode<synchronous>, transform_indices = @transform_11, window_bounds = array<i64: 1, 32>}, {pipeline_mode = #tpu.pipeline_mode<synchronous>, transform_indices = @transform_12, window_bounds = array<i64: 32, 48>}, {pipeline_mode = #tpu.pipeline_mode<synchronous>, transform_indices = @transform_13, window_bounds = array<i64: 1, 48>}, {transform_indices = @transform_14, window_bounds = array<i64: 8, 80>}]} {
    %c0 = arith.constant 0 : index
    %c0_0 = arith.constant 0 : index
    %0 = vector.load %arg1[%c0, %c0_0] : memref<8x48xf32, #tpu.memory_space<vmem>>, vector<8x48xf32>
    %c0_1 = arith.constant 0 : index
    %c0_2 = arith.constant 0 : index
    %1 = vector.load %arg2[%c0_1, %c0_2] : memref<8x16xf32, #tpu.memory_space<vmem>>, vector<8x16xf32>
    %2 = arith.truncf %0 : vector<8x48xf32> to vector<8x48xbf16>
    %c0_3 = arith.constant 0 : index
    %c0_4 = arith.constant 0 : index
    %3 = vector.load %arg3[%c0_3, %c0_4] : memref<48x32xbf16, #tpu.memory_space<vmem>>, vector<48x32xbf16>
    %cst = arith.constant dense<0.000000e+00> : vector<8x32xf32>
    %4 = tpu.matmul %2, %3, %cst {dimension_numbers = #tpu.dot_dimension_numbers<[1], [0], [0], [1], [0, 0, 1, 1], [], []>} : vector<8x48xbf16>, vector<48x32xbf16>, vector<8x32xf32> -> vector<8x32xf32>
    %c0_5 = arith.constant 0 : index
    %c0_6 = arith.constant 0 : index
    %5 = vector.load %arg4[%c0_5, %c0_6] : memref<1x32xf32, #tpu.memory_space<vmem>>, vector<1x32xf32>
    %6 = vector.broadcast %5 : vector<1x32xf32> to vector<8x32xf32>
    %7 = arith.addf %4, %6 : vector<8x32xf32>
    %8 = arith.negf %7 : vector<8x32xf32>
    %9 = math.exp %8 : vector<8x32xf32>
    %cst_7 = arith.constant 1.000000e+00 : f32
    %10 = vector.broadcast %cst_7 : f32 to vector<8x32xf32>
    %11 = arith.addf %10, %9 : vector<8x32xf32>
    %12 = arith.divf %10, %11 : vector<8x32xf32>
    %13 = arith.mulf %7, %12 : vector<8x32xf32>
    %14 = arith.truncf %13 : vector<8x32xf32> to vector<8x32xbf16>
    %c0_8 = arith.constant 0 : index
    %c0_9 = arith.constant 0 : index
    %15 = vector.load %arg5[%c0_8, %c0_9] : memref<32x16xbf16, #tpu.memory_space<vmem>>, vector<32x16xbf16>
    %cst_10 = arith.constant dense<0.000000e+00> : vector<8x16xf32>
    %16 = tpu.matmul %14, %15, %cst_10 {dimension_numbers = #tpu.dot_dimension_numbers<[1], [0], [0], [1], [0, 0, 1, 1], [], []>} : vector<8x32xbf16>, vector<32x16xbf16>, vector<8x16xf32> -> vector<8x16xf32>
    %c0_11 = arith.constant 0 : index
    %c0_12 = arith.constant 0 : index
    %17 = vector.load %arg6[%c0_11, %c0_12] : memref<1x16xf32, #tpu.memory_space<vmem>>, vector<1x16xf32>
    %18 = vector.broadcast %17 : vector<1x16xf32> to vector<8x16xf32>
    %19 = arith.addf %16, %18 : vector<8x16xf32>
    %20 = arith.negf %19 : vector<8x16xf32>
    %21 = math.exp %20 : vector<8x16xf32>
    %cst_13 = arith.constant 1.000000e+00 : f32
    %22 = vector.broadcast %cst_13 : f32 to vector<8x16xf32>
    %23 = arith.addf %22, %21 : vector<8x16xf32>
    %24 = arith.divf %22, %23 : vector<8x16xf32>
    %25 = arith.mulf %19, %24 : vector<8x16xf32>
    %26 = arith.truncf %25 : vector<8x16xf32> to vector<8x16xbf16>
    %c0_14 = arith.constant 0 : index
    %c0_15 = arith.constant 0 : index
    %27 = vector.load %arg7[%c0_14, %c0_15] : memref<16x32xbf16, #tpu.memory_space<vmem>>, vector<16x32xbf16>
    %cst_16 = arith.constant dense<0.000000e+00> : vector<8x32xf32>
    %28 = tpu.matmul %26, %27, %cst_16 {dimension_numbers = #tpu.dot_dimension_numbers<[1], [0], [0], [1], [0, 0, 1, 1], [], []>} : vector<8x16xbf16>, vector<16x32xbf16>, vector<8x32xf32> -> vector<8x32xf32>
    %c0_17 = arith.constant 0 : index
    %c0_18 = arith.constant 0 : index
    %29 = vector.load %arg8[%c0_17, %c0_18] : memref<1x32xf32, #tpu.memory_space<vmem>>, vector<1x32xf32>
    %30 = vector.broadcast %29 : vector<1x32xf32> to vector<8x32xf32>
    %31 = arith.addf %28, %30 : vector<8x32xf32>
    %32 = vector.extract_strided_slice %31 {offsets = [0, 0], sizes = [8, 16], strides = [1, 1]} : vector<8x32xf32> to vector<8x16xf32>
    %33 = vector.extract_strided_slice %31 {offsets = [0, 16], sizes = [8, 16], strides = [1, 1]} : vector<8x32xf32> to vector<8x16xf32>
    %cst_19 = arith.constant 5.000000e-01 : f32
    %34 = vector.broadcast %cst_19 : f32 to vector<8x16xf32>
    %35 = arith.mulf %34, %33 : vector<8x16xf32>
    %36 = math.exp %35 : vector<8x16xf32>
    %37 = arith.mulf %1, %36 : vector<8x16xf32>
    %38 = arith.addf %32, %37 : vector<8x16xf32>
    %39 = arith.truncf %38 : vector<8x16xf32> to vector<8x16xbf16>
    %c0_20 = arith.constant 0 : index
    %c0_21 = arith.constant 0 : index
    %40 = vector.load %arg9[%c0_20, %c0_21] : memref<16x16xbf16, #tpu.memory_space<vmem>>, vector<16x16xbf16>
    %cst_22 = arith.constant dense<0.000000e+00> : vector<8x16xf32>
    %41 = tpu.matmul %39, %40, %cst_22 {dimension_numbers = #tpu.dot_dimension_numbers<[1], [0], [0], [1], [0, 0, 1, 1], [], []>} : vector<8x16xbf16>, vector<16x16xbf16>, vector<8x16xf32> -> vector<8x16xf32>
    %c0_23 = arith.constant 0 : index
    %c0_24 = arith.constant 0 : index
    %42 = vector.load %arg10[%c0_23, %c0_24] : memref<1x16xf32, #tpu.memory_space<vmem>>, vector<1x16xf32>
    %43 = vector.broadcast %42 : vector<1x16xf32> to vector<8x16xf32>
    %44 = arith.addf %41, %43 : vector<8x16xf32>
    %45 = arith.negf %44 : vector<8x16xf32>
    %46 = math.exp %45 : vector<8x16xf32>
    %cst_25 = arith.constant 1.000000e+00 : f32
    %47 = vector.broadcast %cst_25 : f32 to vector<8x16xf32>
    %48 = arith.addf %47, %46 : vector<8x16xf32>
    %49 = arith.divf %47, %48 : vector<8x16xf32>
    %50 = arith.mulf %44, %49 : vector<8x16xf32>
    %51 = arith.truncf %50 : vector<8x16xf32> to vector<8x16xbf16>
    %c0_26 = arith.constant 0 : index
    %c0_27 = arith.constant 0 : index
    %52 = vector.load %arg11[%c0_26, %c0_27] : memref<16x32xbf16, #tpu.memory_space<vmem>>, vector<16x32xbf16>
    %cst_28 = arith.constant dense<0.000000e+00> : vector<8x32xf32>
    %53 = tpu.matmul %51, %52, %cst_28 {dimension_numbers = #tpu.dot_dimension_numbers<[1], [0], [0], [1], [0, 0, 1, 1], [], []>} : vector<8x16xbf16>, vector<16x32xbf16>, vector<8x32xf32> -> vector<8x32xf32>
    %c0_29 = arith.constant 0 : index
    %c0_30 = arith.constant 0 : index
    %54 = vector.load %arg12[%c0_29, %c0_30] : memref<1x32xf32, #tpu.memory_space<vmem>>, vector<1x32xf32>
    %55 = vector.broadcast %54 : vector<1x32xf32> to vector<8x32xf32>
    %56 = arith.addf %53, %55 : vector<8x32xf32>
    %57 = arith.negf %56 : vector<8x32xf32>
    %58 = math.exp %57 : vector<8x32xf32>
    %cst_31 = arith.constant 1.000000e+00 : f32
    %59 = vector.broadcast %cst_31 : f32 to vector<8x32xf32>
    %60 = arith.addf %59, %58 : vector<8x32xf32>
    %61 = arith.divf %59, %60 : vector<8x32xf32>
    %62 = arith.mulf %56, %61 : vector<8x32xf32>
    %63 = arith.truncf %62 : vector<8x32xf32> to vector<8x32xbf16>
    %c0_32 = arith.constant 0 : index
    %c0_33 = arith.constant 0 : index
    %64 = vector.load %arg13[%c0_32, %c0_33] : memref<32x48xbf16, #tpu.memory_space<vmem>>, vector<32x48xbf16>
    %cst_34 = arith.constant dense<0.000000e+00> : vector<8x48xf32>
    %65 = tpu.matmul %63, %64, %cst_34 {dimension_numbers = #tpu.dot_dimension_numbers<[1], [0], [0], [1], [0, 0, 1, 1], [], []>} : vector<8x32xbf16>, vector<32x48xbf16>, vector<8x48xf32> -> vector<8x48xf32>
    %c0_35 = arith.constant 0 : index
    %c0_36 = arith.constant 0 : index
    %66 = vector.load %arg14[%c0_35, %c0_36] : memref<1x48xf32, #tpu.memory_space<vmem>>, vector<1x48xf32>
    %67 = vector.broadcast %66 : vector<1x48xf32> to vector<8x48xf32>
    %68 = arith.addf %65, %67 : vector<8x48xf32>
    %69 = tpu.concatenate %68, %32, %33 in 1 : vector<8x48xf32>, vector<8x16xf32>, vector<8x16xf32> -> vector<8x80xf32>
    %c0_37 = arith.constant 0 : index
    %c0_38 = arith.constant 0 : index
    %70 = vector.load %arg15[%c0_37, %c0_38] : memref<8x80xf32, #tpu.memory_space<vmem>>, vector<8x80xf32>
    tpu.vector_store %arg15[%c0_37, %c0_38], %69 {strides = array<i32>} : memref<8x80xf32, #tpu.memory_space<vmem>>, vector<8x80xf32>,
    return
  }
  func.func @transform_0(%arg0: i32) -> (i32, i32) {
    %c0_i32 = arith.constant 0 : i32
    %c0_i32_0 = arith.constant 0 : i32
    return %arg0, %c0_i32 : i32, i32
  }
  func.func @transform_1(%arg0: i32) -> (i32, i32) {
    %c0_i32 = arith.constant 0 : i32
    %c0_i32_0 = arith.constant 0 : i32
    return %arg0, %c0_i32 : i32, i32
  }
  func.func @transform_2(%arg0: i32) -> (i32, i32) {
    %c0_i32 = arith.constant 0 : i32
    %c0_i32_0 = arith.constant 0 : i32
    %c0_i32_1 = arith.constant 0 : i32
    return %c0_i32, %c0_i32_0 : i32, i32
  }
  func.func @transform_3(%arg0: i32) -> (i32, i32) {
    %c0_i32 = arith.constant 0 : i32
    %c0_i32_0 = arith.constant 0 : i32
    %c0_i32_1 = arith.constant 0 : i32
    return %c0_i32, %c0_i32_0 : i32, i32
  }
  func.func @transform_4(%arg0: i32) -> (i32, i32) {
    %c0_i32 = arith.constant 0 : i32
    %c0_i32_0 = arith.constant 0 : i32
    %c0_i32_1 = arith.constant 0 : i32
    return %c0_i32, %c0_i32_0 : i32, i32
  }
  func.func @transform_5(%arg0: i32) -> (i32, i32) {
    %c0_i32 = arith.constant 0 : i32
    %c0_i32_0 = arith.constant 0 : i32
    %c0_i32_1 = arith.constant 0 : i32
    return %c0_i32, %c0_i32_0 : i32, i32
  }
  func.func @transform_6(%arg0: i32) -> (i32, i32) {
    %c0_i32 = arith.constant 0 : i32
    %c0_i32_0 = arith.constant 0 : i32
    %c0_i32_1 = arith.constant 0 : i32
    return %c0_i32, %c0_i32_0 : i32, i32
  }
  func.func @transform_7(%arg0: i32) -> (i32, i32) {
    %c0_i32 = arith.constant 0 : i32
    %c0_i32_0 = arith.constant 0 : i32
    %c0_i32_1 = arith.constant 0 : i32
    return %c0_i32, %c0_i32_0 : i32, i32
  }
  func.func @transform_8(%arg0: i32) -> (i32, i32) {
    %c0_i32 = arith.constant 0 : i32
    %c0_i32_0 = arith.constant 0 : i32
    %c0_i32_1 = arith.constant 0 : i32
    return %c0_i32, %c0_i32_0 : i32, i32
  }
  func.func @transform_9(%arg0: i32) -> (i32, i32) {
    %c0_i32 = arith.constant 0 : i32
    %c0_i32_0 = arith.constant 0 : i32
    %c0_i32_1 = arith.constant 0 : i32
    return %c0_i32, %c0_i32_0 : i32, i32
  }
  func.func @transform_10(%arg0: i32) -> (i32, i32) {
    %c0_i32 = arith.constant 0 : i32
    %c0_i32_0 = arith.constant 0 : i32
    %c0_i32_1 = arith.constant 0 : i32
    return %c0_i32, %c0_i32_0 : i32, i32
  }
  func.func @transform_11(%arg0: i32) -> (i32, i32) {
    %c0_i32 = arith.constant 0 : i32
    %c0_i32_0 = arith.constant 0 : i32
    %c0_i32_1 = arith.constant 0 : i32
    return %c0_i32, %c0_i32_0 : i32, i32
  }
  func.func @transform_12(%arg0: i32) -> (i32, i32) {
    %c0_i32 = arith.constant 0 : i32
    %c0_i32_0 = arith.constant 0 : i32
    %c0_i32_1 = arith.constant 0 : i32
    return %c0_i32, %c0_i32_0 : i32, i32
  }
  func.func @transform_13(%arg0: i32) -> (i32, i32) {
    %c0_i32 = arith.constant 0 : i32
    %c0_i32_0 = arith.constant 0 : i32
    %c0_i32_1 = arith.constant 0 : i32
    return %c0_i32, %c0_i32_0 : i32, i32
  }
  func.func @transform_14(%arg0: i32) -> (i32, i32) {
    %c0_i32 = arith.constant 0 : i32
    %c0_i32_0 = arith.constant 0 : i32
    return %arg0, %c0_i32 : i32, i32
  }
}

</mosaic_0001>

<bundles_post_ra>
// kernel: vae_forward.1
= control target key start
LH: loop header
LB: loop body
LE: loop exit
PB: predicated region body
PF: predicated region fallthrough
CT: control target
= control target key end

     0   :  { %v607_v0 = vmov 0.0   ;;  %vm608_vm0 = vmmov 0   ;;  %vm82_vm1 = vcmask 392192   ;;  %vm157_vm2 = vcmask 261120   ;;  %s609_s29 = smov 112   ;;  %s610_s30 = smov 48   ;;  %s772_s2 = inlined_call_operand.vmem [shape: bf16[48,32], index: 2, kind: input, shape index: {}]   ;;  %s773_s0 = inlined_call_operand.vmem [shape: f32[8,48], index: 0, kind: input, shape index: {}]   ;;  %s774_s4 = inlined_call_operand.vmem [shape: bf16[32,16], index: 4, kind: input, shape index: {}]   ;;  %s775_s3 = inlined_call_operand.vmem [shape: f32[1,32], index: 3, kind: input, shape index: {}]   ;;  %s776_s6 = inlined_call_operand.vmem [shape: bf16[16,32], index: 6, kind: input, shape index: {}]   ;;  %s777_s5 = inlined_call_operand.vmem [shape: f32[1,16], index: 5, kind: input, shape index: {}]   ;;  %s778_s8 = inlined_call_operand.vmem [shape: bf16[16,16], index: 8, kind: input, shape index: {}]   ;;  %s779_s7 = inlined_call_operand.vmem [shape: f32[1,32], index: 7, kind: input, shape index: {}]   ;;  %s780_s1 = inlined_call_operand.vmem [shape: f32[8,16], index: 1, kind: input, shape index: {}]   ;;  %s781_s10 = inlined_call_operand.vmem [shape: bf16[16,32], index: 10, kind: input, shape index: {}]   ;;  %s782_s9 = inlined_call_operand.vmem [shape: f32[1,16], index: 9, kind: input, shape index: {}]   ;;  %s783_s12 = inlined_call_operand.vmem [shape: bf16[32,48], index: 12, kind: input, shape index: {}]   ;;  %s784_s11 = inlined_call_operand.vmem [shape: f32[1,32], index: 11, kind: input, shape index: {}]   ;;  %s785_s13 = inlined_call_operand.vmem [shape: f32[1,48], index: 13, kind: input, shape index: {}]   ;;  %s786_s14 = inlined_call_operand.vmem [shape: f32[8,80], index: 14, kind: output, shape index: {}]  }
   0x1   :  { %531 = vmatprep.subr.bf16.mxu0 %v607_v0  ;;  %v579_v1 = vld [vmem:[%s772_s2 + $0x10] sm:$0xff]   ;;  %537 = vmatprep.mubr.msk.bf16.mxu0 %vm608_vm0, %v607_v0  ;;  %v580_v2 = vld [vmem:[%s772_s2 + $0x8] sm:$0xff]   ;;  %v581_v3 = vld [vmem:[%s772_s2] sm:$0xff]   ;;  %vm224_vm3 = vcmask 130048   ;;  %vm481_vm4 = vcmask 523264   ;;  %vm483_vm5 = vcmask 654336  }
   0x2   :  { %541 = vmatprep.subr.bf16.mxu1 %v607_v0  ;;  %545 = vmatprep.mubr.msk.bf16.mxu1 %vm608_vm0, %v607_v0  ;;  %v48_v4 = vld [vmem:[%s773_s0] sm:$0xff]  ;;  %v582_v6 = vld [vmem:[%s774_s4 + $0x8] sm:$0xff]  }
   0x3   :  { %532 = vmatpush3.bf16.msra.mxu0 %v579_v1  ;;  %v50_v5 = vpack.c.bf16 %v48_v4, %v48_v4  ;;  %542 = vmatpush3.bf16.msra.mxu1 %v582_v6  ;;  %v583_v7 = vld [vmem:[%s774_s4] sm:$0xff]   ;;  %v587_v61 = vld [vmem:[%s783_s12 + $0x8] sm:$0xff]  }
   0x4   :  { %533 = vmatprep.subr.bf16.mxu0 %v607_v0  ;;  %543 = vmatprep.subr.bf16.mxu1 %v607_v0  ;;  %v489_v8 = vld [vmem:[%s775_s3] ss:$0 sm:$0xff] }
   0x5   :  { %v584_v20 = vld [vmem:[%s776_s6] sm:$0xff]  }
   0x6   :  { %v495_v21 = vld [vmem:[%s777_s5] ss:$0 sm:$0xff] }
   0x7   :  { %534 = vmatpush3.bf16.msra.mxu0 %v580_v2  ;;  %544 = vmatpush3.bf16.msra.mxu1 %v583_v7  ;;  %v585_v33 = vld [vmem:[%s778_s8] sm:$0xff]  }
   0x8   :  { %535 = vmatprep.subr.bf16.mxu0 %v607_v0  ;;  %549 = vmatprep.subr.bf16.mxu1 %v607_v0  ;;  %v500_v34 = vld [vmem:[%s779_s7] ss:$0 sm:$0xff] }
   0x9   :  { %v49_v43 = vld [vmem:[%s780_s1] sm:$0xff] }
   0xa   :  { %v586_v48 = vld [vmem:[%s781_s10] sm:$0xff]  }
   0xb   :  { %536 = vmatpush3.bf16.msra.mxu0 %v581_v3  ;;  %v503_v49 = vld [vmem:[%s782_s9] ss:$0 sm:$0xff] }
   0xc   :  { %555 = vmatprep.subr.bf16.mxu0 %v607_v0  ;;  %v588_v62 = vld [vmem:[%s783_s12] sm:$0xff]  }
   0xd   :  { %v507_v63 = vld [vmem:[%s784_s11] ss:$0 sm:$0xff] }
   0xe   :  { %538 = vmatmul.mubr.msk.bf16.vlgmr.msra.gmra.mxu0 %vm82_vm1, %v50_v5 }
   0xf   :  { %557 = vmatprep.mubr.msk.bf16.mxu0 %vm608_vm0, %v607_v0  ;;  %556 = vmatpush3.bf16.msra.mxu0 %v585_v33 }
  0x10   :  { %567 = vmatprep.subr.bf16.mxu0 %v607_v0 }
  0xce   :  { %v120_v9 = vpop.f32.mrf.mxu0 }
  0xcf   :  { %v121_v10 = vadd.f32 %v489_v8, %v120_v9 }
  0xd0   :  { %v539_v11 = vpop.f32.mrf.mxu0 }
  0xd1   :  { %v494_v12 = vmul.f32 -1.442695, %v121_v10  ;;  %v511_v11 = vld [vmem:[%s785_s13] ss:$0 sm:$0xff] }
  0xd2   :  { %v123_v13 = vpop.f32.mrf.mxu0 }
  0xd3   :  { %589 = vpow2.f32 %v494_v12 }
  0xd4   :  { %v540_v14 = vpop.f32.mrf.mxu0 }
  0xe0   :  { %v590_v15 = vpop.eup %589 }
  0xe1   :  { %v129_v16 = vadd.f32 1.0, %v590_v15 }
  0xe3   :  { %591 = vrcp.f32 %v129_v16 }
  0xf0   :  { %v592_v17 = vpop.eup %591 }
  0xf1   :  { %v132_v18 = vmul.f32 %v592_v17, %v121_v10 }
  0xf3   :  { %v133_v19 = vpack.c.bf16 %v132_v18, %v132_v18 }
  0xf5   :  { %546 = vmatmul.mubr.msk.bf16.vlgmr.msra.gmra.mxu1 %vm157_vm2, %v133_v19 }
  0xf6   :  { %551 = vmatprep.mubr.msk.bf16.mxu1 %vm608_vm0, %v607_v0  ;;  %550 = vmatpush3.bf16.msra.mxu1 %v584_v20 }
  0xf7   :  { %561 = vmatprep.subr.bf16.mxu1 %v607_v0 }
 0x1b5   :  { %v195_v22 = vpop.f32.mrf.mxu1 }
 0x1b6   :  { %v196_v23 = vadd.f32 %v495_v21, %v195_v22 }
 0x1b7   :  { %v547_v24 = vpop.f32.mrf.mxu1 }
 0x1b8   :  { %v499_v25 = vmul.f32 -1.442695, %v196_v23 }
 0x1b9   :  { %v198_v26 = vpop.f32.mrf.mxu1 }
 0x1ba   :  { %593 = vpow2.f32 %v499_v25 }
 0x1bb   :  { %v548_v27 = vpop.f32.mrf.mxu1 }
 0x1c7   :  { %v594_v28 = vpop.eup %593 }
 0x1c8   :  { %v204_v29 = vadd.f32 1.0, %v594_v28 }
 0x1ca   :  { %595 = vrcp.f32 %v204_v29 }
 0x1d7   :  { %v596_v30 = vpop.eup %595 }
 0x1d8   :  { %v207_v31 = vmul.f32 %v596_v30, %v196_v23 }
 0x1da   :  { %v208_v32 = vpack.c.bf16 %v207_v31, %v207_v31 }
 0x1dc   :  { %552 = vmatmul.mubr.msk.bf16.vlgmr.msra.gmra.mxu1 %vm224_vm3, %v208_v32 }
 0x1dd   :  { %563 = vmatprep.mubr.msk.bf16.mxu1 %vm608_vm0, %v607_v0  ;;  %562 = vmatpush3.bf16.msra.mxu1 %v586_v48 }
 0x29c   :  { %v262_v35 = vpop.f32.mrf.mxu1 }
 0x29d   :  { %v263_v36 = vadd.f32 %v500_v34, %v262_v35 }
 0x29e   :  { %v553_v37 = vpop.f32.mrf.mxu1 }
 0x29f   :  { %v268_v38 = vmul.f32 0.5, %v263_v36 }
 0x2a0   :  { %v265_v39 = vpop.f32.mrf.mxu1 }
 0x2a1   :  { %v269_v40 = vmul.f32 1.442695, %v268_v38 }
 0x2a2   :  { %v554_v41 = vpop.f32.mrf.mxu1 }
 0x2a3   :  { %597 = vpow2.f32 %v269_v40 }
 0x2b0   :  { %v598_v42 = vpop.eup %597 }
 0x2b1   :  { %272 = vrot.lane.b32.xlu0 %v598_v42, %s609_s29 }
 0x2b5   :  { %477 = vrot.lane.b32.xlu0 %v263_v36, %s610_s30 }
 0x323   :  { %v273_v44 = vpop.permute.xlu0 %272 }
 0x324   :  { %v275_v45 = vmul.f32 %v273_v44, %v49_v43 }
 0x326   :  { %v276_v46 = vadd.f32 %v275_v45, %v263_v36 }
 0x327   :  { %v478_v14 = vpop.permute.xlu0 %477 }
 0x328   :  { %v277_v47 = vpack.c.bf16 %v276_v46, %v276_v46 }
 0x32a   :  { %558 = vmatmul.mubr.msk.bf16.vlgmr.msra.gmra.mxu0 %vm224_vm3, %v277_v47 }
 0x32b   :  { %571 = vmatprep.mubr.msk.bf16.mxu0 %vm608_vm0, %v607_v0  ;;  %568 = vmatpush3.bf16.msra.mxu0 %v587_v61 }
 0x32c   :  { %569 = vmatprep.subr.bf16.mxu0 %v607_v0 }
 0x32f   :  { %570 = vmatpush3.bf16.msra.mxu0 %v588_v62 }
 0x3ea   :  { %v330_v50 = vpop.f32.mrf.mxu0 }
 0x3eb   :  { %v331_v51 = vadd.f32 %v503_v49, %v330_v50 }
 0x3ec   :  { %v559_v52 = vpop.f32.mrf.mxu0 }
 0x3ed   :  { %v506_v53 = vmul.f32 -1.442695, %v331_v51 }
 0x3ee   :  { %v333_v54 = vpop.f32.mrf.mxu0 }
 0x3ef   :  { %599 = vpow2.f32 %v506_v53 }
 0x3f0   :  { %v560_v55 = vpop.f32.mrf.mxu0 }
 0x3fc   :  { %v600_v56 = vpop.eup %599 }
 0x3fd   :  { %v339_v57 = vadd.f32 1.0, %v600_v56 }
 0x3ff   :  { %601 = vrcp.f32 %v339_v57 }
 0x40c   :  { %v602_v58 = vpop.eup %601 }
 0x40d   :  { %v342_v59 = vmul.f32 %v602_v58, %v331_v51 }
 0x40f   :  { %v343_v60 = vpack.c.bf16 %v342_v59, %v342_v59 }
 0x411   :  { %564 = vmatmul.mubr.msk.bf16.vlgmr.msra.gmra.mxu1 %vm224_vm3, %v343_v60 }
 0x4d1   :  { %v396_v1 = vpop.f32.mrf.mxu1 }
 0x4d2   :  { %v397_v2 = vadd.f32 %v507_v63, %v396_v1 }
 0x4d3   :  { %v565_v3 = vpop.f32.mrf.mxu1 }
 0x4d4   :  { %v510_v4 = vmul.f32 -1.442695, %v397_v2 }
 0x4d5   :  { %v399_v5 = vpop.f32.mrf.mxu1 }
 0x4d6   :  { %603 = vpow2.f32 %v510_v4 }
 0x4d7   :  { %v566_v6 = vpop.f32.mrf.mxu1 }
 0x4e3   :  { %v604_v7 = vpop.eup %603 }
 0x4e4   :  { %v405_v8 = vadd.f32 1.0, %v604_v7 }
 0x4e6   :  { %605 = vrcp.f32 %v405_v8 }
 0x4f3   :  { %v606_v0 = vpop.eup %605 }
 0x4f4   :  { %v408_v9 = vmul.f32 %v606_v0, %v397_v2 }
 0x4f6   :  { %v409_v10 = vpack.c.bf16 %v408_v9, %v408_v9 }
 0x4f8   :  { %572 = vmatmul.mubr.msk.bf16.vlgmr.msra.gmra.mxu0 %vm157_vm2, %v409_v10 }
 0x5b8   :  { %v470_v12 = vpop.f32.mrf.mxu0 }
 0x5b9   :  { %v471_v13 = vadd.f32 %v511_v11, %v470_v12 }
 0x5ba   :  { %v573_v15 = vpop.f32.mrf.mxu0 }
 0x5bb   :  { %v480_v16 = vsel %vm82_vm1, %v471_v13, %v478_v14 }
 0x5bc   :  { %v482_v17 = vsel %vm481_vm4, %v480_v16, %v478_v14  ;;  %v473_v18 = vpop.f32.mrf.mxu0 }
 0x5bd   :  { %484 = vst.msk [vmem:[%s786_s14] sm:$0xff] %vm483_vm5, %v482_v17 }
 0x5be   :  { %v574_v19 = vpop.f32.mrf.mxu0 }

</bundles_post_ra>
